<compile_context>
chip_gen: v7x
topology: tpu7x:2x2x1
jax: 0.10.0
libtpu: 0.0.40
codegen_flags: <defaults>
</compile_context>

<pallas_src>
import functools
import math

import jax
import jax.numpy as jnp
from jax.experimental import pallas as pl
from jax.experimental.pallas import tpu as pltpu

_EPS = 1e-5


def critic_kernel(inv_batch,
                  x_ref, a_ref,
                  w1_ref, gamma_ref, beta_ref,
                  w2s_ref, w2a_ref, b2_ref,
                  w3_ref, b3_ref,
                  out_ref):
    # ---- fc1 (whole batch, bf16 MXU matmul, f32 accumulation) ----
    # b1 omitted: BatchNorm is shift-invariant (see header).
    h1 = jnp.dot(x_ref[...].astype(jnp.bfloat16), w1_ref[...],
                 preferred_element_type=jnp.float32)

    # ---- BatchNorm1d, full-batch statistics (training mode) ----
    mean = jnp.sum(h1, axis=0, keepdims=True) * inv_batch
    centered = h1 - mean
    var = jnp.sum(centered * centered, axis=0, keepdims=True) * inv_batch
    scale = gamma_ref[...] * jax.lax.rsqrt(var + _EPS)
    h = jnp.maximum(centered * scale + beta_ref[...], 0.0)          # BN + ReLU

    # ---- fc2 over concat([h, action], dim=1) as a split matmul ----
    h2 = (jnp.dot(h.astype(jnp.bfloat16), w2s_ref[...],
                  preferred_element_type=jnp.float32)
          + b2_ref[...])

    a = a_ref[...]
    action_size = a_ref.shape[1]
    if action_size <= 8:
        # Tiny contraction -> rank-1 VPU FMAs instead of an MXU matmul.
        for k in range(action_size):
            h2 = h2 + a[:, k:k + 1] * w2a_ref[k:k + 1, :]
    else:
        h2 = h2 + jnp.dot(a.astype(jnp.bfloat16),
                          w2a_ref[...].astype(jnp.bfloat16),
                          preferred_element_type=jnp.float32)
    h2 = jnp.maximum(h2, 0.0)

    # ---- fc3 (out_features == 1): VPU multiply + lane reduction ----
    out_ref[...] = (jnp.sum(h2 * w3_ref[...], axis=-1, keepdims=True)
                    + b3_ref[...])


def critic_forward(x, action, params):
    """x: [B, state_size], action: [B, action_size] -> Q: [B, 1] (f32)."""
    # b1 is accepted but intentionally unused in the kernel (BN shift-invariance).
    (w1, _b1, gamma, beta, w2s, w2a, b2, w3, b3) = params
    B, state_size = x.shape
    action_size = action.shape[1]
    fc1_dim = w1.shape[1]
    fc2_dim = w2s.shape[1]

    # Whole-batch-resident kernel; f32 temps are ~B*(fc1+fc2)*4 bytes.
    assert B <= 4096, "single-pass whole-batch kernel; tile for larger batches"

    kernel = functools.partial(critic_kernel, 1.0 / B)
    full = lambda i: (0, 0)   # single grid step: every block is the full array

    grid_spec = pltpu.PrefetchScalarGridSpec(
        num_scalar_prefetch=0,
        grid=(1,),
        in_specs=[
            pl.BlockSpec((B, state_size), full),             # x
            pl.BlockSpec((B, action_size), full),            # action
            pl.BlockSpec((state_size, fc1_dim), full),       # w1 (bf16)
            pl.BlockSpec((1, fc1_dim), full),                # gamma
            pl.BlockSpec((1, fc1_dim), full),                # beta
            pl.BlockSpec((fc1_dim, fc2_dim), full),          # w2[:fc1]  (bf16)
            pl.BlockSpec((action_size, fc2_dim), full),      # w2[fc1:]  (f32, VPU)
            pl.BlockSpec((1, fc2_dim), full),                # b2
            pl.BlockSpec((1, fc2_dim), full),                # w3 as a row vector
            pl.BlockSpec((1, 1), full),                      # b3
        ],
        out_specs=pl.BlockSpec((B, 1), full),
    )

    return pl.pallas_call(
        kernel,
        out_shape=jax.ShapeDtypeStruct((B, 1), jnp.float32),
        grid_spec=grid_spec,
        compiler_params=pltpu.CompilerParams(
            dimension_semantics=("arbitrary",)),
    )(x, action, w1, gamma, beta, w2s, w2a, b2, w3, b3)


def critic_reference(x, action, params):
    """Pure-JAX f32 reference with the exact PyTorch forward (incl. b1)."""
    (w1, b1, gamma, beta, w2s, w2a, b2, w3, b3) = params
    h1 = x @ w1.astype(jnp.float32) + b1
    mean = jnp.mean(h1, axis=0, keepdims=True)
    var = jnp.mean((h1 - mean) ** 2, axis=0, keepdims=True)   # biased, as torch BN
    h = jnp.maximum(gamma * (h1 - mean) * jax.lax.rsqrt(var + _EPS) + beta, 0.0)
    h2 = jnp.maximum(h @ w2s.astype(jnp.float32) + action @ w2a + b2, 0.0)
    return h2 @ w3.T + b3


def init_params(key, state_size, action_size, fc1_dim=400, fc2_dim=300):
    """Mimics Critic.reset_parameters() uniform ranges. MXU matmul weights in
    bf16; biases / BN affine / action-half of fc2 / fc3 row kept in f32."""
    ks = jax.random.split(key, 6)
    lim1 = 1.0 / math.sqrt(fc1_dim)   # hidden_init uses weight.size()[0] = out_features
    lim2 = 1.0 / math.sqrt(fc2_dim)
    w1 = jax.random.uniform(ks[0], (state_size, fc1_dim), jnp.float32, -lim1, lim1)
    b1 = jax.random.uniform(ks[1], (1, fc1_dim), jnp.float32, -lim1, lim1)
    gamma = jnp.ones((1, fc1_dim), jnp.float32)    # BatchNorm1d default affine init
    beta = jnp.zeros((1, fc1_dim), jnp.float32)
    # fc2 weight is [fc1_dim + action_size, fc2_dim]; stored pre-split for the
    # concat-free split matmul.
    w2 = jax.random.uniform(ks[2], (fc1_dim + action_size, fc2_dim), jnp.float32,
                            -lim2, lim2)
    b2 = jax.random.uniform(ks[3], (1, fc2_dim), jnp.float32, -lim2, lim2)
    w3 = jax.random.uniform(ks[4], (1, fc2_dim), jnp.float32, -0.003, 0.003)
    b3 = jax.random.uniform(ks[5], (1, 1), jnp.float32, -0.003, 0.003)
    return (w1.astype(jnp.bfloat16), b1, gamma, beta,
            w2[:fc1_dim].astype(jnp.bfloat16), w2[fc1_dim:],   # action half stays f32
            b2, w3, b3)


if __name__ == "__main__":
    key = jax.random.PRNGKey(0)
    k_x, k_a, k_p = jax.random.split(key, 3)

    batch = 32
    state_size = 16
    action_size = 4
    fc1_dim, fc2_dim = 400, 300   # module defaults

    x = jax.random.normal(k_x, (batch, state_size), jnp.float32)
    action = jax.random.normal(k_a, (batch, action_size), jnp.float32)
    params = init_params(k_p, state_size, action_size, fc1_dim, fc2_dim)

    q = critic_forward(x, action, params)
    jax.block_until_ready(q)

    assert q.shape == (batch, 1) and q.dtype == jnp.float32
    assert bool(jnp.all(jnp.isfinite(q)))

    # Loose tolerance: kernel uses bf16 MXU operands (f32 accumulation).
    q_ref = critic_reference(x, action, params)
    assert bool(jnp.allclose(q, q_ref, atol=1e-2, rtol=1e-1))

    print("KERNEL_OK")
</pallas_src>

<mosaic_0001>
module attributes {stable_mosaic.version = 11 : i64} {
  func.func @critic_kernel(%arg0: i32, %arg1: memref<32x16xf32, #tpu.memory_space<vmem>>, %arg2: memref<32x4xf32, #tpu.memory_space<vmem>>, %arg3: memref<16x400xbf16, #tpu.memory_space<vmem>>, %arg4: memref<1x400xf32, #tpu.memory_space<vmem>>, %arg5: memref<1x400xf32, #tpu.memory_space<vmem>>, %arg6: memref<400x300xbf16, #tpu.memory_space<vmem>>, %arg7: memref<4x300xf32, #tpu.memory_space<vmem>>, %arg8: memref<1x300xf32, #tpu.memory_space<vmem>>, %arg9: memref<1x300xf32, #tpu.memory_space<vmem>>, %arg10: memref<1x1xf32, #tpu.memory_space<vmem>>, %arg11: memref<32x1xf32, #tpu.memory_space<vmem>>) attributes {dimension_semantics = [#tpu.dimension_semantics<arbitrary>], iteration_bounds = array<i64: 1>, scalar_prefetch = 0 : i64, scratch_operands = 0 : i64, tpu.core_type = #tpu.core_type<tc>, window_params = [{pipeline_mode = #tpu.pipeline_mode<synchronous>, transform_indices = @transform_0, window_bounds = array<i64: 32, 16>}, {pipeline_mode = #tpu.pipeline_mode<synchronous>, transform_indices = @transform_1, window_bounds = array<i64: 32, 4>}, {pipeline_mode = #tpu.pipeline_mode<synchronous>, transform_indices = @transform_2, window_bounds = array<i64: 16, 400>}, {pipeline_mode = #tpu.pipeline_mode<synchronous>, transform_indices = @transform_3, window_bounds = array<i64: 1, 400>}, {pipeline_mode = #tpu.pipeline_mode<synchronous>, transform_indices = @transform_4, window_bounds = array<i64: 1, 400>}, {pipeline_mode = #tpu.pipeline_mode<synchronous>, transform_indices = @transform_5, window_bounds = array<i64: 400, 300>}, {pipeline_mode = #tpu.pipeline_mode<synchronous>, transform_indices = @transform_6, window_bounds = array<i64: 4, 300>}, {pipeline_mode = #tpu.pipeline_mode<synchronous>, transform_indices = @transform_7, window_bounds = array<i64: 1, 300>}, {pipeline_mode = #tpu.pipeline_mode<synchronous>, transform_indices = @transform_8, window_bounds = array<i64: 1, 300>}, {pipeline_mode = #tpu.pipeline_mode<synchronous>, transform_indices = @transform_9, window_bounds = array<i64: 1, 1>}, {pipeline_mode = #tpu.pipeline_mode<synchronous>, transform_indices = @transform_10, window_bounds = array<i64: 32, 1>}]} {
    %c0 = arith.constant 0 : index
    %c0_0 = arith.constant 0 : index
    %0 = vector.load %arg1[%c0, %c0_0] : memref<32x16xf32, #tpu.memory_space<vmem>>, vector<32x16xf32>
    %1 = arith.truncf %0 : vector<32x16xf32> to vector<32x16xbf16>
    %c0_1 = arith.constant 0 : index
    %c0_2 = arith.constant 0 : index
    %2 = vector.load %arg3[%c0_1, %c0_2] : memref<16x400xbf16, #tpu.memory_space<vmem>>, vector<16x400xbf16>
    %cst = arith.constant dense<0.000000e+00> : vector<32x400xf32>
    %3 = tpu.matmul %1, %2, %cst {dimension_numbers = #tpu.dot_dimension_numbers<[1], [0], [0], [1], [0, 0, 1, 1], [], []>} : vector<32x16xbf16>, vector<16x400xbf16>, vector<32x400xf32> -> vector<32x400xf32>
    %cst_3 = arith.constant dense<0.000000e+00> : vector<400xf32>
    %4 = vector.multi_reduction <add>, %3, %cst_3 [0] : vector<32x400xf32> to vector<400xf32>
    %5 = vector.shape_cast %4 : vector<400xf32> to vector<1x400xf32>
    %cst_4 = arith.constant 3.125000e-02 : f32
    %6 = vector.broadcast %cst_4 : f32 to vector<1x400xf32>
    %7 = arith.mulf %5, %6 : vector<1x400xf32>
    %8 = vector.broadcast %7 : vector<1x400xf32> to vector<32x400xf32>
    %9 = arith.subf %3, %8 : vector<32x400xf32>
    %10 = arith.mulf %9, %9 : vector<32x400xf32>
    %cst_5 = arith.constant dense<0.000000e+00> : vector<400xf32>
    %11 = vector.multi_reduction <add>, %10, %cst_5 [0] : vector<32x400xf32> to vector<400xf32>
    %12 = vector.shape_cast %11 : vector<400xf32> to vector<1x400xf32>
    %cst_6 = arith.constant 3.125000e-02 : f32
    %13 = vector.broadcast %cst_6 : f32 to vector<1x400xf32>
    %14 = arith.mulf %12, %13 : vector<1x400xf32>
    %c0_7 = arith.constant 0 : index
    %c0_8 = arith.constant 0 : index
    %15 = vector.load %arg4[%c0_7, %c0_8] : memref<1x400xf32, #tpu.memory_space<vmem>>, vector<1x400xf32>
    %cst_9 = arith.constant 9.99999974E-6 : f32
    %16 = vector.broadcast %cst_9 : f32 to vector<1x400xf32>
    %17 = arith.addf %14, %16 : vector<1x400xf32>
    %18 = math.rsqrt %17 : vector<1x400xf32>
    %19 = arith.mulf %15, %18 : vector<1x400xf32>
    %20 = vector.broadcast %19 : vector<1x400xf32> to vector<32x400xf32>
    %21 = arith.mulf %9, %20 : vector<32x400xf32>
    %c0_10 = arith.constant 0 : index
    %c0_11 = arith.constant 0 : index
    %22 = vector.load %arg5[%c0_10, %c0_11] : memref<1x400xf32, #tpu.memory_space<vmem>>, vector<1x400xf32>
    %23 = vector.broadcast %22 : vector<1x400xf32> to vector<32x400xf32>
    %24 = arith.addf %21, %23 : vector<32x400xf32>
    %cst_12 = arith.constant 0.000000e+00 : f32
    %25 = vector.broadcast %cst_12 : f32 to vector<32x400xf32>
    %26 = arith.maximumf %24, %25 : vector<32x400xf32>
    %27 = arith.truncf %26 : vector<32x400xf32> to vector<32x400xbf16>
    %c0_13 = arith.constant 0 : index
    %c0_14 = arith.constant 0 : index
    %28 = vector.load %arg6[%c0_13, %c0_14] : memref<400x300xbf16, #tpu.memory_space<vmem>>, vector<400x300xbf16>
    %cst_15 = arith.constant dense<0.000000e+00> : vector<32x300xf32>
    %29 = tpu.matmul %27, %28, %cst_15 {dimension_numbers = #tpu.dot_dimension_numbers<[1], [0], [0], [1], [0, 0, 1, 1], [], []>} : vector<32x400xbf16>, vector<400x300xbf16>, vector<32x300xf32> -> vector<32x300xf32>
    %c0_16 = arith.constant 0 : index
    %c0_17 = arith.constant 0 : index
    %30 = vector.load %arg8[%c0_16, %c0_17] : memref<1x300xf32, #tpu.memory_space<vmem>>, vector<1x300xf32>
    %31 = vector.broadcast %30 : vector<1x300xf32> to vector<32x300xf32>
    %32 = arith.addf %29, %31 : vector<32x300xf32>
    %c0_18 = arith.constant 0 : index
    %c0_19 = arith.constant 0 : index
    %33 = vector.load %arg2[%c0_18, %c0_19] : memref<32x4xf32, #tpu.memory_space<vmem>>, vector<32x4xf32>
    %34 = vector.extract_strided_slice %33 {offsets = [0, 0], sizes = [32, 1], strides = [1, 1]} : vector<32x4xf32> to vector<32x1xf32>
    %c0_20 = arith.constant 0 : index
    %c0_21 = arith.constant 0 : index
    %35 = vector.load %arg7[%c0_20, %c0_21] : memref<4x300xf32, #tpu.memory_space<vmem>>, vector<1x300xf32>
    %36 = vector.broadcast %34 : vector<32x1xf32> to vector<32x300xf32>
    %37 = vector.broadcast %35 : vector<1x300xf32> to vector<32x300xf32>
    %38 = arith.mulf %36, %37 : vector<32x300xf32>
    %39 = arith.addf %32, %38 : vector<32x300xf32>
    %40 = vector.extract_strided_slice %33 {offsets = [0, 1], sizes = [32, 1], strides = [1, 1]} : vector<32x4xf32> to vector<32x1xf32>
    %c1 = arith.constant 1 : index
    %c0_22 = arith.constant 0 : index
    %41 = vector.load %arg7[%c1, %c0_22] : memref<4x300xf32, #tpu.memory_space<vmem>>, vector<1x300xf32>
    %42 = vector.broadcast %40 : vector<32x1xf32> to vector<32x300xf32>
    %43 = vector.broadcast %41 : vector<1x300xf32> to vector<32x300xf32>
    %44 = arith.mulf %42, %43 : vector<32x300xf32>
    %45 = arith.addf %39, %44 : vector<32x300xf32>
    %46 = vector.extract_strided_slice %33 {offsets = [0, 2], sizes = [32, 1], strides = [1, 1]} : vector<32x4xf32> to vector<32x1xf32>
    %c2 = arith.constant 2 : index
    %c0_23 = arith.constant 0 : index
    %47 = vector.load %arg7[%c2, %c0_23] : memref<4x300xf32, #tpu.memory_space<vmem>>, vector<1x300xf32>
    %48 = vector.broadcast %46 : vector<32x1xf32> to vector<32x300xf32>
    %49 = vector.broadcast %47 : vector<1x300xf32> to vector<32x300xf32>
    %50 = arith.mulf %48, %49 : vector<32x300xf32>
    %51 = arith.addf %45, %50 : vector<32x300xf32>
    %52 = vector.extract_strided_slice %33 {offsets = [0, 3], sizes = [32, 1], strides = [1, 1]} : vector<32x4xf32> to vector<32x1xf32>
    %c3 = arith.constant 3 : index
    %c0_24 = arith.constant 0 : index
    %53 = vector.load %arg7[%c3, %c0_24] : memref<4x300xf32, #tpu.memory_space<vmem>>, vector<1x300xf32>
    %54 = vector.broadcast %52 : vector<32x1xf32> to vector<32x300xf32>
    %55 = vector.broadcast %53 : vector<1x300xf32> to vector<32x300xf32>
    %56 = arith.mulf %54, %55 : vector<32x300xf32>
    %57 = arith.addf %51, %56 : vector<32x300xf32>
    %cst_25 = arith.constant 0.000000e+00 : f32
    %58 = vector.broadcast %cst_25 : f32 to vector<32x300xf32>
    %59 = arith.maximumf %57, %58 : vector<32x300xf32>
    %c0_26 = arith.constant 0 : index
    %c0_27 = arith.constant 0 : index
    %60 = vector.load %arg9[%c0_26, %c0_27] : memref<1x300xf32, #tpu.memory_space<vmem>>, vector<1x300xf32>
    %61 = vector.broadcast %60 : vector<1x300xf32> to vector<32x300xf32>
    %62 = arith.mulf %59, %61 : vector<32x300xf32>
    %cst_28 = arith.constant dense<0.000000e+00> : vector<32xf32>
    %63 = vector.multi_reduction <add>, %62, %cst_28 [1] : vector<32x300xf32> to vector<32xf32>
    %64 = vector.shape_cast %63 : vector<32xf32> to vector<32x1xf32>
    %c0_29 = arith.constant 0 : index
    %c0_30 = arith.constant 0 : index
    %65 = vector.load %arg10[%c0_29, %c0_30] : memref<1x1xf32, #tpu.memory_space<vmem>>, vector<1x1xf32>
    %66 = vector.broadcast %65 : vector<1x1xf32> to vector<32x1xf32>
    %67 = arith.addf %64, %66 : vector<32x1xf32>
    %c0_31 = arith.constant 0 : index
    %c0_32 = arith.constant 0 : index
    %68 = vector.load %arg11[%c0_31, %c0_32] : memref<32x1xf32, #tpu.memory_space<vmem>>, vector<32x1xf32>
    tpu.vector_store %arg11[%c0_31, %c0_32], %67 {strides = array<i32>} : memref<32x1xf32, #tpu.memory_space<vmem>>, vector<32x1xf32>,
    return
  }
  func.func @transform_0(%arg0: i32) -> (i32, i32) {
    %c0_i32 = arith.constant 0 : i32
    %c0_i32_0 = arith.constant 0 : i32
    %c0_i32_1 = arith.constant 0 : i32
    return %c0_i32, %c0_i32_0 : i32, i32
  }
  func.func @transform_1(%arg0: i32) -> (i32, i32) {
    %c0_i32 = arith.constant 0 : i32
    %c0_i32_0 = arith.constant 0 : i32
    %c0_i32_1 = arith.constant 0 : i32
    return %c0_i32, %c0_i32_0 : i32, i32
  }
  func.func @transform_2(%arg0: i32) -> (i32, i32) {
    %c0_i32 = arith.constant 0 : i32
    %c0_i32_0 = arith.constant 0 : i32
    %c0_i32_1 = arith.constant 0 : i32
    return %c0_i32, %c0_i32_0 : i32, i32
  }
  func.func @transform_3(%arg0: i32) -> (i32, i32) {
    %c0_i32 = arith.constant 0 : i32
    %c0_i32_0 = arith.constant 0 : i32
    %c0_i32_1 = arith.constant 0 : i32
    return %c0_i32, %c0_i32_0 : i32, i32
  }
  func.func @transform_4(%arg0: i32) -> (i32, i32) {
    %c0_i32 = arith.constant 0 : i32
    %c0_i32_0 = arith.constant 0 : i32
    %c0_i32_1 = arith.constant 0 : i32
    return %c0_i32, %c0_i32_0 : i32, i32
  }
  func.func @transform_5(%arg0: i32) -> (i32, i32) {
    %c0_i32 = arith.constant 0 : i32
    %c0_i32_0 = arith.constant 0 : i32
    %c0_i32_1 = arith.constant 0 : i32
    return %c0_i32, %c0_i32_0 : i32, i32
  }
  func.func @transform_6(%arg0: i32) -> (i32, i32) {
    %c0_i32 = arith.constant 0 : i32
    %c0_i32_0 = arith.constant 0 : i32
    %c0_i32_1 = arith.constant 0 : i32
    return %c0_i32, %c0_i32_0 : i32, i32
  }
  func.func @transform_7(%arg0: i32) -> (i32, i32) {
    %c0_i32 = arith.constant 0 : i32
    %c0_i32_0 = arith.constant 0 : i32
    %c0_i32_1 = arith.constant 0 : i32
    return %c0_i32, %c0_i32_0 : i32, i32
  }
  func.func @transform_8(%arg0: i32) -> (i32, i32) {
    %c0_i32 = arith.constant 0 : i32
    %c0_i32_0 = arith.constant 0 : i32
    %c0_i32_1 = arith.constant 0 : i32
    return %c0_i32, %c0_i32_0 : i32, i32
  }
  func.func @transform_9(%arg0: i32) -> (i32, i32) {
    %c0_i32 = arith.constant 0 : i32
    %c0_i32_0 = arith.constant 0 : i32
    %c0_i32_1 = arith.constant 0 : i32
    return %c0_i32, %c0_i32_0 : i32, i32
  }
  func.func @transform_10(%arg0: i32) -> (i32, i32) {
    %c0_i32 = arith.constant 0 : i32
    %c0_i32_0 = arith.constant 0 : i32
    %c0_i32_1 = arith.constant 0 : i32
    return %c0_i32, %c0_i32_0 : i32, i32
  }
}

</mosaic_0001>

<bundles_post_ra>
// kernel: tpu_custom_call.1
= control target key start
LH: loop header
LB: loop body
LE: loop exit
PB: predicated region body
PF: predicated region fallthrough
CT: control target
= control target key end

     0   :  { %s2304_s0 = inlined_call_operand.vmem [shape: f32[32,16], index: 0, kind: input, shape index: {}]   ;;  %s2305_s1 = inlined_call_operand.vmem [shape: f32[32,4], index: 1, kind: input, shape index: {}]   ;;  %s2306_s2 = inlined_call_operand.vmem [shape: bf16[16,400], index: 2, kind: input, shape index: {}]   ;;  %s2307_s3 = inlined_call_operand.vmem [shape: f32[1,400], index: 3, kind: input, shape index: {}]   ;;  %s2308_s4 = inlined_call_operand.vmem [shape: f32[1,400], index: 4, kind: input, shape index: {}]   ;;  %s2309_s5 = inlined_call_operand.hbm [shape: bf16[400,300], index: 5, kind: input, shape index: {}]   ;;  %s2310_s6 = inlined_call_operand.vmem [shape: f32[4,300], index: 6, kind: input, shape index: {}]   ;;  %s2311_s7 = inlined_call_operand.vmem [shape: f32[1,300], index: 7, kind: input, shape index: {}]   ;;  %s2312_s8 = inlined_call_operand.vmem [shape: f32[1,300], index: 8, kind: input, shape index: {}]   ;;  %s2313_s9 = inlined_call_operand.<no memory space> [shape: f32[1,1], index: 9, kind: input, shape index: {}]   ;;  %s2314_s10 = inlined_call_operand.vmem [shape: f32[32,1], index: 10, kind: output, shape index: {}]  }
   0x1   :  { %v15_v0 = vstv %s2313_s9 }
   0x2   :  { %16 = vst [vmem:[#allocation2] sm:$0x1] %v15_v0 }
   0x3   :  { %17 = vsyncpa [#allocation4], 0  ;;  %s1791_s15 = smov [#allocation3]   ;;  %s1767_s19 = scalar_lea.hbm %s2309_s5, 9600 }
   0x4   :  { %s33_s16 = sshll.u32 %s1791_s15, 4  ;;  %p1768_p0 = scmp.ne.s32.totalorder %s2309_s5, %s1767_s19  ;;  %s34_s16 = int_to_ptr.vmem [resolvable:$true] %s33_s16 }
   0x5   :  { %p1771_p1 = scmp.lt.u32.totalorder %s1767_s19, %s2309_s5 }
   0x7   :  { %p1773_p2 = pnand %p1771_p1, %p1768_p0 }
   0x9   :  { %1776 = shalt.err (!%p1773_p2)
}
   0xa   :  { %s1777_s9 = scalar_lea.vmem %s34_s16, 9600  ;;  %p1782_p4 = scmp.lt.s32.totalorder %s34_s16, %s34_s16 }
   0xb   :  { %p1778_p3 = scmp.ne.s32.totalorder %s34_s16, %s1777_s9  ;;  %p1783_p5 = scmp.lt.s32.totalorder %s1777_s9, %s1777_s9 }
   0xd   :  { %p1784_p6 = por %p1783_p5, %p1782_p4 }
   0xf   :  { %p1785_p7 = pnand %p1784_p6, %p1778_p3 }
  0x11   :  { %1788 = shalt.err (!%p1785_p7)
}
  0x12   :  { %s1792_s24 = smov 192   ;;  %s1793_s25 = smov 12  }
  0x13   :  { %39 = dma.hbm_to_vmem [thread:$0]  %s2309_s5, 9600, %s34_s16, [#allocation4], %s1792_s24, %s1792_s24, %s1793_s25  }
  0x14   :  { %1789 = dma.done.wait [#allocation4], 9600  }
  0x15   :  { %1790 = vsyncadd [#allocation4], 4294957696  ;;  %v1794_v1 = vmov 0   ;;  %v1653_v2 = vld [vmem:[%s2306_s2 + $0x4] ss:$16 sps:$4 sm:$0xff]   ;;  %v53_v5 = vld [vmem:[%s2304_s0 + $0x8] sm:$0xff] }
  0x16   :  { %121 = vmatprep.mubr.bf16.mxu1 %v1794_v1  ;;  %1646 = vset.pattern.permute.xlu1 %v1794_v1  ;;  %v1655_v3 = vld [vmem:[%s2306_s2] ss:$16 sps:$4 sm:$0xff]   ;;  %vm82_vm0 = vcmask 130048   ;;  %v1656_v7 = vld [vmem:[%s2306_s2 + $0x8] ss:$16 sps:$4 sm:$0xff]   ;;  %vm1461_vm1 = vcmask 359424  }
  0x17   :  { %1645 = vset.pattern.permute.xlu0 %v1794_v1  ;;  %v52_v4 = vld [vmem:[%s2304_s0] sm:$0xff]  ;;  %89 = vmatprep.subr.bf16.mxu1 %v1653_v2  ;;  %v1658_v8 = vld [vmem:[%s2306_s2 + $0xc] ss:$16 sps:$4 sm:$0xff]   ;;  %v54_v9 = vld [vmem:[%s2304_s0 + $0x10] sm:$0xff]  ;;  %vm1492_vm2 = vcmask 7168  }
  0x18   :  { %v56_v6 = vpack.c.bf16 %v53_v5, %v52_v4  ;;  %90 = vmatpush1.bf16.msra.mxu1 %v1655_v3  ;;  %v55_v10 = vld [vmem:[%s2304_s0 + $0x18] sm:$0xff]  ;;  %v1659_v12 = vld [vmem:[#allocation3 + $0x4] ss:$12 sps:$4 sm:$0xff]   ;;  %v1661_v13 = vld [vmem:[#allocation3] ss:$12 sps:$4 sm:$0xff]  }
  0x19   :  { %142 = vmatprep.subr.bf16.mxu1 %v1658_v8  ;;  %v57_v11 = vpack.c.bf16 %v55_v10, %v54_v9  ;;  %976 = vmatprep.subr.bf16.mxu0 %v1659_v12  ;;  %v1662_v14 = vld [vmem:[#allocation3 + $0x1c] ss:$12 sps:$4 sm:$0xff]   ;;  %v1664_v15 = vld [vmem:[#allocation3 + $0x18] ss:$12 sps:$4 sm:$0xff]   ;;  %v1665_v16 = vld [vmem:[#allocation3 + $0x34] ss:$12 sps:$4 sm:$0xff]  }
  0x1a   :  { %977 = vmatpush1.bf16.msra.mxu0 %v1661_v13  ;;  %v1667_v17 = vld [vmem:[#allocation3 + $0x30] ss:$12 sps:$4 sm:$0xff]   ;;  %v1668_v18 = vld [vmem:[#allocation3 + $0x4c] ss:$12 sps:$4 sm:$0xff]   ;;  %v1670_v19 = vld [vmem:[#allocation3 + $0x48] ss:$12 sps:$4 sm:$0xff]  }
  0x1b   :  { %1506 = vmatmul.mubr.msk.bf16.vlgmr.msra.gmra.mrb[0].mxu1 %vm82_vm0, %v56_v6  ;;  %978 = vmatprep.subr.bf16.mxu0 %v1662_v14  ;;  %v1671_v20 = vld [vmem:[#allocation3 + $0x64] ss:$12 sps:$4 sm:$0xff]   ;;  %v1673_v21 = vld [vmem:[#allocation3 + $0x60] ss:$12 sps:$4 sm:$0xff]   ;;  %v1674_v22 = vld [vmem:[#allocation3 + $0x7c] ss:$12 sps:$4 sm:$0xff]  }
  0x1c   :  { %143 = vmatpush1.bf16.msra.mxu1 %v1656_v7  ;;  %131 = vmatprep.mubr.bf16.mxu1 %v1794_v1  ;;  %v1676_v23 = vld [vmem:[#allocation3 + $0x78] ss:$12 sps:$4 sm:$0xff]   ;;  %v1677_v24 = vld [vmem:[#allocation3 + $0x94] ss:$12 sps:$4 sm:$0xff]   ;;  %v1679_v25 = vld [vmem:[#allocation3 + $0x90] ss:$12 sps:$4 sm:$0xff]  }
  0x1d   :  { %v1680_v26 = vld [vmem:[#allocation3 + $0xac] ss:$12 sps:$4 sm:$0xff]   ;;  %v1682_v27 = vld [vmem:[#allocation3 + $0xa8] ss:$12 sps:$4 sm:$0xff]   ;;  %v1683_v28 = vld [vmem:[#allocation3 + $0xc4] ss:$12 sps:$4 sm:$0xff]  }
  0x1e   :  { %979 = vmatpush1.bf16.msra.mxu0 %v1664_v15  ;;  %v1685_v29 = vld [vmem:[#allocation3 + $0xc8] ss:$12 sps:$4 sm:$0xff]   ;;  %v1686_v30 = vld [vmem:[#allocation3 + $0xc0] ss:$12 sps:$4 sm:$0xff]   ;;  %v1691_v34 = vld [vmem:[#allocation3 + $0xd8] ss:$12 sps:$4 sm:$0xff]  }
  0x1f   :  { %980 = vmatprep.subr.bf16.mxu0 %v1665_v16  ;;  %v1687_v31 = vld [vmem:[#allocation3 + $0x8] ss:$12 sps:$4 sm:$0xff]   ;;  %1593 = vmatprep.subr.bf16.mxu1 %v1685_v29  ;;  %v1690_v33 = vld [vmem:[#allocation3 + $0xe0] ss:$12 sps:$4 sm:$0xff]   ;;  %v1695_v37 = vld [vmem:[#allocation3 + $0xf8] ss:$12 sps:$4 sm:$0xff]  }
  0x20   :  { %v1688_v32 = vld [vmem:[#allocation3 + $0xdc] ss:$12 sps:$4 sm:$0xff]   ;;  %v1692_v35 = vld [vmem:[#allocation3 + $0x20] ss:$12 sps:$4 sm:$0xff]   ;;  %v1697_v39 = vld [vmem:[#allocation3 + $0x38] ss:$12 sps:$4 sm:$0xff]  }
  0x21   :  { %v1693_v36 = vld [vmem:[#allocation3 + $0xf4] ss:$12 sps:$4 sm:$0xff]   ;;  %v1696_v38 = vld [vmem:[#allocation3 + $0xf0] ss:$12 sps:$4 sm:$0xff]   ;;  %v1698_v40 = vld [vmem:[#allocation3 + $0x10c] ss:$12 sps:$4 sm:$0xff]  }
  0x22   :  { %981 = vmatpush1.bf16.msra.mxu0 %v1667_v17  ;;  %v1700_v41 = vld [vmem:[#allocation3 + $0x110] ss:$12 sps:$4 sm:$0xff]   ;;  %v1701_v42 = vld [vmem:[#allocation3 + $0x108] ss:$12 sps:$4 sm:$0xff]   ;;  %v1706_v46 = vld [vmem:[#allocation3 + $0x120] ss:$12 sps:$4 sm:$0xff]  }
  0x23   :  { %1507 = vmatmul.mubr.msk.bf16.gmra.mrb[4].mxu1 %vm82_vm0, %v57_v11  ;;  %982 = vmatprep.subr.bf16.mxu0 %v1668_v18  ;;  %v1702_v43 = vld [vmem:[#allocation3 + $0x50] ss:$12 sps:$4 sm:$0xff]   ;;  %v1705_v45 = vld [vmem:[#allocation3 + $0x128] ss:$12 sps:$4 sm:$0xff]   ;;  %v1710_v49 = vld [vmem:[#allocation3 + $0x140] ss:$12 sps:$4 sm:$0xff]  }
  0x24   :  { %174 = vmatprep.mubr.bf16.mxu1 %v1794_v1  ;;  %v1703_v44 = vld [vmem:[#allocation3 + $0x124] ss:$12 sps:$4 sm:$0xff]   ;;  %v1707_v47 = vld [vmem:[#allocation3 + $0x68] ss:$12 sps:$4 sm:$0xff]   ;;  %v1712_v51 = vld [vmem:[#allocation3 + $0x80] ss:$12 sps:$4 sm:$0xff]  }
  0x25   :  { %v1708_v48 = vld [vmem:[#allocation3 + $0x13c] ss:$12 sps:$4 sm:$0xff]   ;;  %v1711_v50 = vld [vmem:[#allocation3 + $0x138] ss:$12 sps:$4 sm:$0xff]   ;;  %v1713_v52 = vld [vmem:[#allocation3 + $0x154] ss:$12 sps:$4 sm:$0xff]  }
  0x26   :  { %983 = vmatpush1.bf16.msra.mxu0 %v1670_v19  ;;  %v1715_v53 = vld [vmem:[#allocation3 + $0x158] ss:$12 sps:$4 sm:$0xff]   ;;  %v1716_v54 = vld [vmem:[#allocation3 + $0x150] ss:$12 sps:$4 sm:$0xff]   ;;  %v1721_v58 = vld [vmem:[#allocation3 + $0x168] ss:$12 sps:$4 sm:$0xff]  }
  0x27   :  { %984 = vmatprep.subr.bf16.mxu0 %v1671_v20  ;;  %v1717_v55 = vld [vmem:[#allocation3 + $0x98] ss:$12 sps:$4 sm:$0xff]   ;;  %v1720_v57 = vld [vmem:[#allocation3 + $0x170] ss:$12 sps:$4 sm:$0xff]  }
  0x28   :  { %v1718_v56 = vld [vmem:[#allocation3 + $0x16c] ss:$12 sps:$4 sm:$0xff]   ;;  %v1722_v59 = vld [vmem:[#allocation3 + $0xb0] ss:$12 sps:$4 sm:$0xff]  }
  0x29   :  { %v1725_v60 = vld [vmem:[#allocation3 + $0x184] ss:$12 sps:$4 sm:$0xff]  }
  0x2a   :  { %985 = vmatpush1.bf16.msra.mxu0 %v1673_v21 }
  0x2b   :  { %1508 = vmatmul.mubr.msk.bf16.vlgmr.msra.gmra.mrb[8].mxu1 %vm82_vm0, %v56_v6  ;;  %986 = vmatprep.subr.bf16.mxu0 %v1674_v22 }
  0x2c   :  { %184 = vmatprep.mubr.bf16.mxu1 %v1794_v1  ;;  %1594 = vmatpush3.bf16.msra.mxu1 %v1687_v31 }
  0x2d   :  { %1595 = vmatprep.subr.bf16.mxu1 %v1690_v33 }
  0x2e   :  { %987 = vmatpush1.bf16.msra.mxu0 %v1676_v23 }
  0x2f   :  { %988 = vmatprep.subr.bf16.mxu0 %v1677_v24 }
  0x30   :  { %1596 = vmatpush3.bf16.msra.mxu1 %v1692_v35 }
  0x31   :  { %1597 = vmatprep.subr.bf16.mxu1 %v1695_v37  ;;  %v1931_v37 = vld [vmem:[%s2305_s1] sm:$0xff] }
  0x32   :  { %989 = vmatpush1.bf16.msra.mxu0 %v1679_v25  ;;  %1187 = vperm.xlu0 %1645, %v1931_v37  }
  0x33   :  { %1509 = vmatmul.mubr.msk.bf16.gmra.mrb[12].mxu1 %vm82_vm0, %v57_v11  ;;  %990 = vmatprep.subr.bf16.mxu0 %v1680_v26 }
  0x34   :  { %1598 = vmatpush3.bf16.msra.mxu1 %v1697_v39 }
  0x35   :  { %1599 = vmatprep.subr.bf16.mxu1 %v1700_v41 }
  0x36   :  { %991 = vmatpush1.bf16.msra.mxu0 %v1682_v27 }
  0x37   :  { %992 = vmatprep.subr.bf16.mxu0 %v1683_v28 }
  0x38   :  { %1600 = vmatpush3.bf16.msra.mxu1 %v1702_v43 }
  0x39   :  { %1601 = vmatprep.subr.bf16.mxu1 %v1705_v45 }
  0x3a   :  { %993 = vmatpush1.bf16.msra.mxu0 %v1686_v30 }
  0x3b   :  { %994 = vmatprep.subr.bf16.mxu0 %v1688_v32 }
  0x3c   :  { %1602 = vmatpush3.bf16.msra.mxu1 %v1707_v47 }
  0x3d   :  { %1603 = vmatprep.subr.bf16.mxu1 %v1710_v49 }
  0x3e   :  { %995 = vmatpush1.bf16.msra.mxu0 %v1691_v34 }
  0x3f   :  { %996 = vmatprep.subr.bf16.mxu0 %v1693_v36  ;;  %v1926_v36 = vld [vmem:[%s2305_s1 + $0x10] sm:$0xff] }
  0x40   :  { %1604 = vmatpush3.bf16.msra.mxu1 %v1712_v51  ;;  %1197 = vperm.xlu1 %1646, %v1926_v36  }
  0x41   :  { %1605 = vmatprep.subr.bf16.mxu1 %v1715_v53 }
  0x42   :  { %997 = vmatpush1.bf16.msra.mxu0 %v1696_v38 }
  0x43   :  { %998 = vmatprep.subr.bf16.mxu0 %v1698_v40 }
  0x44   :  { %1606 = vmatpush3.bf16.msra.mxu1 %v1717_v55 }
  0x45   :  { %1607 = vmatprep.subr.bf16.mxu1 %v1720_v57 }
  0x46   :  { %999 = vmatpush1.bf16.msra.mxu0 %v1701_v42 }
  0x47   :  { %1000 = vmatprep.subr.bf16.mxu0 %v1703_v44 }
  0x48   :  { %1608 = vmatpush3.bf16.msra.mxu1 %v1722_v59 }
  0x49   :  { %1131 = vmatprep.subr.bf16.mxu1 %v1794_v1 }
  0x4a   :  { %1001 = vmatpush1.bf16.msra.mxu0 %v1706_v46  ;;  %v1952_v46 = vld [vmem:[%s2305_s1 + $0x18] sm:$0xff] }
  0x4b   :  { %1002 = vmatprep.subr.bf16.mxu0 %v1708_v48  ;;  %1202 = vperm.xlu1 %1646, %v1952_v46  }
  0x4e   :  { %1003 = vmatpush1.bf16.msra.mxu0 %v1711_v50 }
  0x4f   :  { %1004 = vmatprep.subr.bf16.mxu0 %v1713_v52 }
  0x52   :  { %1005 = vmatpush1.bf16.msra.mxu0 %v1716_v54 }
  0x53   :  { %1006 = vmatprep.subr.bf16.mxu0 %v1718_v56  ;;  %v1976_v56 = vld [vmem:[%s2305_s1 + $0x8] sm:$0xff] }
  0x54   :  { %1192 = vperm.xlu0 %1645, %v1976_v56  }
  0x56   :  { %1007 = vmatpush1.bf16.msra.mxu0 %v1721_v58 }
  0x57   :  { %1029 = vmatprep.subr.bf16.mxu0 %v1725_v60 }
  0xee   :  { %v123_v61 = vpop.f32.mrb[0].mxu1 }
  0xef   :  { %v125_v62 = vpop.f32.mrb[1].mxu1 }
  0xf0   :  { %v127_v63 = vpop.f32.mrb[2].mxu1 }
  0xf1   :  { %v195_v0 = vadd.f32 %v127_v63, %v123_v61  ;;  %v129_v2 = vpop.f32.mrb[3].mxu1 }
  0xf2   :  { %v204_v3 = vadd.f32 %v129_v2, %v125_v62 }
  0xf6   :  { %v133_v4 = vpop.f32.mrb[4].mxu1 }
  0xf7   :  { %v196_v5 = vadd.f32 %v195_v0, %v133_v4  ;;  %v135_v6 = vpop.f32.mrb[5].mxu1 }
  0xf8   :  { %v205_v7 = vadd.f32 %v204_v3, %v135_v6  ;;  %v137_v8 = vpop.f32.mrb[6].mxu1 }
  0xf9   :  { %v197_v9 = vadd.f32 %v196_v5, %v137_v8  ;;  %v139_v10 = vpop.f32.mrb[7].mxu1 }
  0xfa   :  { %v206_v11 = vadd.f32 %v205_v7, %v139_v10 }
  0xfb   :  { %v198_v12 = vrot.slane %v197_v9, 4 }
  0xfc   :  { %v207_v13 = vrot.slane %v206_v11, 4 }
  0xfd   :  { %v199_v14 = vadd.f32 %v198_v12, %v197_v9 }
  0xfe   :  { %v208_v15 = vadd.f32 %v207_v13, %v206_v11  ;;  %v1904_v16 = vpop.f32.mrb[8].mxu1 }
  0xff   :  { %v200_v17 = vrot.slane %v199_v14, 2  ;;  %v1906_v18 = vpop.f32.mrb[9].mxu1 }
 0x100   :  { %v209_v19 = vrot.slane %v208_v15, 2  ;;  %v1908_v20 = vpop.f32.mrb[10].mxu1  ;;  %v222_v25 = vsel %vm82_vm0, %v1906_v18, 0.0 }
 0x101   :  { %v201_v21 = vadd.f32 %v200_v17, %v199_v14  ;;  %v213_v22 = vadd.f32 %v1908_v20, %v1904_v16  ;;  %v1912_v23 = vpop.f32.mrb[11].mxu1 }
 0x102   :  { %v210_v24 = vadd.f32 %v209_v19, %v208_v15  ;;  %v223_v26 = vsel %vm82_vm0, %v1912_v23, 0.0 }
 0x103   :  { %v202_v27 = vrot.slane %v201_v21, 1  ;;  %v224_v28 = vadd.f32 %v223_v26, %v222_v25 }
 0x104   :  { %v211_v29 = vrot.slane %v210_v24, 1 }
 0x105   :  { %v203_v30 = vadd.f32 %v202_v27, %v201_v21 }
 0x106   :  { %v212_v31 = vadd.f32 %v211_v29, %v210_v24  ;;  %v1918_v32 = vpop.f32.mrb[12].mxu1 }
 0x107   :  { %v235_v33 = vmul.f32 0.03125, %v203_v30  ;;  %v214_v34 = vadd.f32 %v213_v22, %v1918_v32  ;;  %v1921_v35 = vpop.f32.mrb[13].mxu1  ;;  %v1796_v30 = vmov 2  }
 0x108   :  { %v236_v38 = vmul.f32 0.03125, %v212_v31  ;;  %v225_v39 = vsel %vm82_vm0, %v1921_v35, 0.0  ;;  %v1935_v40 = vpop.f32.mrb[14].mxu1 }
 0x109   :  { %v1939_v41 = vsub.f32 %v123_v61, %v235_v33  ;;  %v1941_v42 = vsub.f32 %v127_v63, %v235_v33  ;;  %v1943_v43 = vsub.f32 %v133_v4, %v235_v33  ;;  %v1945_v44 = vsub.f32 %v137_v8, %v235_v33  ;;  %v1947_v45 = vpop.f32.mrb[15].mxu1 }
 0x10a   :  { %v1954_v47 = vsub.f32 %v125_v62, %v236_v38  ;;  %v1956_v48 = vsub.f32 %v129_v2, %v236_v38  ;;  %v1958_v49 = vsub.f32 %v135_v6, %v236_v38  ;;  %v1960_v50 = vsub.f32 %v139_v10, %v236_v38 }
 0x10b   :  { %v255_v51 = vmul.f32 %v1939_v41, %v1939_v41  ;;  %v259_v52 = vmul.f32 %v1941_v42, %v1941_v42  ;;  %v263_v53 = vmul.f32 %v1943_v43, %v1943_v43  ;;  %v226_v58 = vadd.f32 %v225_v39, %v224_v28 }
 0x10c   :  { %v256_v54 = vmul.f32 %v1954_v47, %v1954_v47  ;;  %v260_v55 = vmul.f32 %v1956_v48, %v1956_v48  ;;  %v215_v59 = vadd.f32 %v214_v34, %v1935_v40  ;;  %v227_v60 = vsel %vm82_vm0, %v1947_v45, 0.0 }
 0x10d   :  { %v271_v57 = vadd.f32 %v259_v52, %v255_v51  ;;  %v264_v61 = vmul.f32 %v1958_v49, %v1958_v49  ;;  %v267_v63 = vmul.f32 %v1945_v44, %v1945_v44  ;;  %v228_v3 = vadd.f32 %v227_v60, %v226_v58 }
 0x10e   :  { %v280_v62 = vadd.f32 %v260_v55, %v256_v54  ;;  %v216_v2 = vrot.slane %v215_v59, 4  ;;  %v268_v4 = vmul.f32 %v1960_v50, %v1960_v50  ;;  %v1795_v6 = vmov 1  }
 0x10f   :  { %v272_v0 = vadd.f32 %v271_v57, %v263_v53  ;;  %1648 = vset.pattern.permute.xlu1 %v1795_v6  ;;  %v229_v9 = vrot.slane %v228_v3, 4  ;;  %1647 = vset.pattern.permute.xlu0 %v1795_v6 }
 0x110   :  { %v281_v5 = vadd.f32 %v280_v62, %v264_v61  ;;  %v217_v8 = vadd.f32 %v216_v2, %v215_v59  ;;  %1252 = vperm.xlu1 %1648, %v1976_v56   ;;  %1248 = vperm.xlu0 %1647, %v1931_v37   ;;  %v1797_v61 = vmov 3  }
 0x111   :  { %v273_v7 = vadd.f32 %v272_v0, %v267_v63  ;;  %v230_v13 = vadd.f32 %v229_v9, %v228_v3 }
 0x112   :  { %v282_v10 = vadd.f32 %v281_v5, %v268_v4  ;;  %v218_v12 = vrot.slane %v217_v8, 2 }
 0x113   :  { %v274_v11 = vrot.slane %v273_v7, 4  ;;  %v231_v19 = vrot.slane %v230_v13, 2 }
 0x114   :  { %v283_v14 = vrot.slane %v282_v10, 4  ;;  %v219_v17 = vadd.f32 %v218_v12, %v217_v8  ;;  %1256 = vperm.xlu1 %1648, %v1926_v36   ;;  %1260 = vperm.xlu0 %1647, %v1952_v46  }
 0x115   :  { %v275_v15 = vadd.f32 %v274_v11, %v273_v7  ;;  %v232_v25 = vadd.f32 %v231_v19, %v230_v13 }
 0x116   :  { %v284_v21 = vadd.f32 %v283_v14, %v282_v10  ;;  %v220_v24 = vrot.slane %v219_v17, 1 }
 0x117   :  { %v276_v22 = vrot.slane %v275_v15, 2  ;;  %v233_v29 = vrot.slane %v232_v25, 1 }
 0x118   :  { %v285_v26 = vrot.slane %v284_v21, 2  ;;  %v221_v28 = vadd.f32 %v220_v24, %v219_v17  ;;  %1649 = vset.pattern.permute.xlu1 %v1796_v30  ;;  %1650 = vset.pattern.permute.xlu0 %v1796_v30 }
 0x119   :  { %v277_v27 = vadd.f32 %v276_v22, %v275_v15  ;;  %1306 = vperm.xlu1 %1649, %v1931_v37   ;;  %v234_v38 = vadd.f32 %v233_v29, %v232_v25  ;;  %1310 = vperm.xlu0 %1650, %v1976_v56  }
 0x11a   :  { %v286_v31 = vadd.f32 %v285_v26, %v284_v21  ;;  %v237_v34 = vmul.f32 0.03125, %v221_v28 }
 0x11b   :  { %v278_v33 = vrot.slane %v277_v27, 1  ;;  %v238_v58 = vmul.f32 0.03125, %v234_v38 }
 0x11c   :  { %v287_v39 = vrot.slane %v286_v31, 1  ;;  %v1995_v52 = vsub.f32 %v1904_v16, %v237_v34  ;;  %v1998_v53 = vsub.f32 %v1908_v20, %v237_v34  ;;  %v2001_v54 = vsub.f32 %v1918_v32, %v237_v34 }
 0x11d   :  { %v279_v51 = vadd.f32 %v278_v33, %v277_v27  ;;  %v2004_v57 = vsub.f32 %v1935_v40, %v237_v34  ;;  %1314 = vperm.xlu1 %1649, %v1926_v36   ;;  %1651 = vset.pattern.permute.xlu0 %v1797_v61  ;;  %v2014_v62 = vsub.f32 %v1906_v18, %v238_v58 }
 0x11e   :  { %v288_v55 = vadd.f32 %v287_v39, %v286_v31  ;;  %v257_v60 = vmul.f32 %v1995_v52, %v1995_v52  ;;  %v261_v16 = vmul.f32 %v1998_v53, %v1998_v53  ;;  %v265_v32 = vmul.f32 %v2001_v54, %v2001_v54  ;;  %1364 = vperm.xlu0 %1651, %v1931_v37  }
 0x11f   :  { %v311_v59 = vmul.f32 0.03125, %v279_v51  ;;  %v2017_v40 = vsub.f32 %v1912_v23, %v238_v58  ;;  %v2021_v2 = vsub.f32 %v1921_v35, %v238_v58  ;;  %v2024_v3 = vsub.f32 %v1947_v45, %v238_v58 }
 0x120   :  { %v312_v20 = vmul.f32 0.03125, %v288_v55  ;;  %v289_v0 = vadd.f32 %v261_v16, %v257_v60  ;;  %v258_v5 = vmul.f32 %v2014_v62, %v2014_v62  ;;  %v269_v23 = vmul.f32 %v2004_v57, %v2004_v57 }
 0x121   :  { %v316_v63 = vadd.f32 1e-05, %v311_v59  ;;  %v262_v18 = vmul.f32 %v2017_v40, %v2017_v40  ;;  %1318 = vperm.xlu1 %1649, %v1952_v46   ;;  %v266_v35 = vmul.f32 %v2021_v2, %v2021_v2  ;;  %v270_v45 = vmul.f32 %v2024_v3, %v2024_v3 }
 0x122   :  { %v317_v4 = vadd.f32 1e-05, %v312_v20  ;;  %v290_v37 = vadd.f32 %v289_v0, %v265_v32  ;;  %v298_v6 = vsel %vm82_vm0, %v258_v5, 0.0  ;;  %1376 = vperm.xlu0 %1651, %v1952_v46   ;;  %v1798_v39 = vmov 1966171168  }
 0x123   :  { %1759 = vrsqrt.f32 %v316_v63  ;;  %v299_v7 = vsel %vm82_vm0, %v262_v18, 0.0  ;;  %v301_v10 = vsel %vm82_vm0, %v266_v35, 0.0  ;;  %v303_v13 = vsel %vm82_vm0, %v270_v45, 0.0  ;;  %v315_v0 = vld [vmem:[%s2307_s3] sm:$0xf] }
 0x124   :  { %1761 = vrsqrt.f32 %v317_v4  ;;  %v291_v8 = vadd.f32 %v290_v37, %v269_v23  ;;  %v300_v9 = vadd.f32 %v299_v7, %v298_v6  ;;  %v331_v51 = vunpack.c.l.s4 %v1798_v39  ;;  %v391_v37 = vld [vmem:[%s2308_s4] sm:$0xf] }
 0x125   :  { %1652 = vset.pattern.permute.xlu1 %v1797_v61 }
 0x126   :  { %v292_v11 = vrot.slane %v291_v8, 4  ;;  %v302_v12 = vadd.f32 %v301_v10, %v300_v9  ;;  %1368 = vperm.xlu1 %1652, %v1976_v56   ;;  %v332_v55 = vunpack.c.0.s8 %v331_v51 }
 0x128   :  { %v293_v14 = vadd.f32 %v292_v11, %v291_v8  ;;  %v304_v15 = vadd.f32 %v303_v13, %v302_v12 }
 0x12a   :  { %v294_v17 = vrot.slane %v293_v14, 2  ;;  %v305_v19 = vrot.slane %v304_v15, 4  ;;  %1372 = vperm.xlu1 %1652, %v1926_v36   ;;  %v333_v36 = vlaneseq }
 0x12c   :  { %v295_v22 = vadd.f32 %v294_v17, %v293_v14  ;;  %v306_v46 = vadd.f32 %v305_v19, %v304_v15  ;;  %v334_v58 = vshrl.u32 %v333_v36, 7 }
 0x12d   :  { %v1760_v21 = vpop.eup %1759 }
 0x12e   :  { %v1762_v24 = vpop.eup %1761  ;;  %v296_v26 = vrot.slane %v295_v22, 1  ;;  %v307_v27 = vrot.slane %v306_v46, 2  ;;  %v335_v60 = vsub.s32 %v332_v55, %v334_v58  ;;  %v2047_v5 = vsub.s32 0, %v334_v58 }
 0x12f   :  { %v328_v25 = vcombine.low %v1760_v21, %v1762_v24  ;;  %v2049_v18 = vsub.s32 1, %v334_v58  ;;  %v369_v23 = vsub.s32 3, %v334_v58  ;;  %v2054_v45 = vsub.s32 2, %v334_v58 }
 0x130   :  { %v297_v28 = vadd.f32 %v296_v26, %v295_v22  ;;  %v308_v29 = vadd.f32 %v307_v27, %v306_v46  ;;  %v396_v10 = vrot.slane %v391_v37, %v2047_v5 }
 0x131   :  { %v336_v20 = vrot.slane %v328_v25, %v335_v60  ;;  %v400_v6 = vrot.slane %v391_v37, %v2049_v18  ;;  %v2061_v11 = vrot.slane %v391_v37, %v2054_v45  ;;  %v408_v12 = vrot.slane %v391_v37, %v369_v23 }
 0x132   :  { %v313_v30 = vmul.f32 0.03125, %v297_v28  ;;  %v309_v31 = vrot.slane %v308_v29, 1 }
 0x134   :  { %v310_v56 = vadd.f32 %v309_v31, %v308_v29  ;;  %v318_v33 = vadd.f32 1e-05, %v313_v30 }
 0x136   :  { %v314_v34 = vmul.f32 0.03125, %v310_v56  ;;  %1763 = vrsqrt.f32 %v318_v33 }
 0x138   :  { %v319_v38 = vadd.f32 1e-05, %v314_v34  ;;  %v1726_v34 = vld [vmem:[#allocation3 + $0x188] ss:$12 sps:$4 sm:$0xff]  }
 0x13a   :  { %1765 = vrsqrt.f32 %v319_v38 }
 0x140   :  { %v1764_v59 = vpop.eup %1763 }
 0x144   :  { %v1766_v16 = vpop.eup %1765 }
 0x145   :  { %v329_v61 = vcombine.low %v1764_v59, %v1766_v16  ;;  %v1729_v59 = vld [vmem:[#allocation3 + $0x19c] ss:$12 sps:$4 sm:$0xff]  }
 0x147   :  { %v343_v32 = vrot.slane %v329_v61, %v335_v60 }
 0x149   :  { %v344_v63 = vcombine.low %v336_v20, %v343_v32 }
 0x14b   :  { %v351_v4 = vrot.slane %v344_v63, %v335_v60 }
 0x14d   :  { %v353_v35 = vmul.f32 %v351_v4, %v315_v0  ;;  %v1730_v0 = vld [vmem:[#allocation3 + $0x1a0] ss:$12 sps:$4 sm:$0xff]  }
 0x14f   :  { %v370_v7 = vrot.slane %v353_v35, %v369_v23  ;;  %v362_v8 = vrot.slane %v353_v35, %v2049_v18  ;;  %v358_v9 = vrot.slane %v353_v35, %v2047_v5  ;;  %v366_v27 = vrot.slane %v353_v35, %v2054_v45 }
 0x151   :  { %v390_v13 = vmul.f32 %v370_v7, %v2024_v3  ;;  %v376_v14 = vmul.f32 %v362_v8, %v1954_v47  ;;  %v380_v15 = vmul.f32 %v362_v8, %v1956_v48  ;;  %v375_v17 = vmul.f32 %v358_v9, %v1939_v41 }
 0x152   :  { %v379_v19 = vmul.f32 %v358_v9, %v1941_v42  ;;  %v384_v21 = vmul.f32 %v362_v8, %v1958_v49  ;;  %v388_v22 = vmul.f32 %v362_v8, %v1960_v50  ;;  %v383_v46 = vmul.f32 %v358_v9, %v1943_v43  ;;  %v1723_v43 = vld [vmem:[#allocation3 + $0x180] ss:$12 sps:$4 sm:$0xff]  }
 0x153   :  { %v414_v24 = vadd.f32 %v400_v6, %v376_v14  ;;  %v418_v25 = vadd.f32 %v400_v6, %v380_v15  ;;  %v413_v26 = vadd.f32 %v396_v10, %v375_v17  ;;  %v387_v48 = vmul.f32 %v358_v9, %v1945_v44  ;;  %v1731_v15 = vld [vmem:[#allocation3 + $0x1b0] ss:$12 sps:$4 sm:$0xff]   ;;  %v1734_v17 = vld [vmem:[#allocation3 + $0x1b8] ss:$12 sps:$4 sm:$0xff]  }
 0x154   :  { %v417_v3 = vadd.f32 %v396_v10, %v379_v19  ;;  %v422_v28 = vadd.f32 %v400_v6, %v384_v21  ;;  %v426_v47 = vadd.f32 %v400_v6, %v388_v22  ;;  %v428_v29 = vadd.f32 %v408_v12, %v390_v13  ;;  %v1737_v21 = vld [vmem:[#allocation3 + $0x1cc] ss:$12 sps:$4 sm:$0xff]  }
 0x155   :  { %v430_v41 = vmax.f32 %v414_v24, 0.0  ;;  %v434_v30 = vmax.f32 %v418_v25, 0.0  ;;  %v429_v42 = vmax.f32 %v413_v26, 0.0  ;;  %v421_v50 = vadd.f32 %v396_v10, %v383_v46  ;;  %v1735_v46 = vld [vmem:[#allocation3 + $0x1c8] ss:$12 sps:$4 sm:$0xff]  }
 0x156   :  { %v433_v31 = vmax.f32 %v417_v3, 0.0  ;;  %v438_v49 = vmax.f32 %v422_v28, 0.0  ;;  %v442_v56 = vmax.f32 %v426_v47, 0.0  ;;  %v425_v38 = vadd.f32 %v396_v10, %v387_v48  ;;  %v1738_v24 = vld [vmem:[#allocation3 + $0x1d0] ss:$12 sps:$4 sm:$0xff]  }
 0x157   :  { %v446_v33 = vpack.c.bf16 %v434_v30, %v430_v41  ;;  %v378_v39 = vmul.f32 %v370_v7, %v2014_v62  ;;  %v382_v51 = vmul.f32 %v370_v7, %v2017_v40  ;;  %v437_v58 = vmax.f32 %v421_v50, 0.0  ;;  %v1739_v25 = vld [vmem:[#allocation3 + $0x1e0] ss:$12 sps:$4 sm:$0xff]   ;;  %v1742_v26 = vld [vmem:[#allocation3 + $0x1e8] ss:$12 sps:$4 sm:$0xff]   ;;  %v1198_v50 = vpop.permute.xlu1 %1197 }
 0x158   :  { %v445_v36 = vpack.c.bf16 %v433_v31, %v429_v42  ;;  %v450_v55 = vpack.c.bf16 %v442_v56, %v438_v49  ;;  %v377_v44 = vmul.f32 %v366_v27, %v1995_v52  ;;  %v441_v60 = vmax.f32 %v425_v38, 0.0  ;;  %v1727_v52 = vld [vmem:[#allocation3 + $0x198] ss:$12 sps:$4 sm:$0xff]   ;;  %v1746_v28 = vld [vmem:[#allocation3 + $0x200] ss:$12 sps:$4 sm:$0xff]  }
 0x159   :  { %1008 = vmatprep.mubr.bf16.mxu0 %v446_v33  ;;  %1114 = vmatprep.mubr.bf16.mxu1 %v446_v33  ;;  %v416_v16 = vadd.f32 %v408_v12, %v378_v39  ;;  %v420_v61 = vadd.f32 %v408_v12, %v382_v51  ;;  %v381_v20 = vmul.f32 %v366_v27, %v1998_v53  ;;  %v444_v32 = vmax.f32 %v428_v29, 0.0  ;;  %v1733_v53 = vld [vmem:[#allocation3 + $0x1b4] ss:$12 sps:$4 sm:$0xff]   ;;  %v1743_v3 = vld [vmem:[#allocation3 + $0x1f8] ss:$12 sps:$4 sm:$0xff]  }
 0x15a   :  { %1009 = vmatmul.mubr.bf16.vlgmr.msra.gmra.mrb[0].mxu0 %v445_v36  ;;  %1115 = vmatmul.mubr.bf16.vlgmr.msra.gmra.mrb[16].mxu1 %v445_v36  ;;  %v415_v62 = vadd.f32 %v2061_v11, %v377_v44  ;;  %v386_v40 = vmul.f32 %v370_v7, %v2021_v2  ;;  %v385_v63 = vmul.f32 %v366_v27, %v2001_v54  ;;  %v1749_v47 = vld [vmem:[#allocation3 + $0x214] ss:$12 sps:$4 sm:$0xff]   ;;  %v1747_v48 = vld [vmem:[#allocation3 + $0x210] ss:$12 sps:$4 sm:$0xff]   ;;  %v1750_v29 = vld [vmem:[#allocation3 + $0x218] ss:$12 sps:$4 sm:$0xff]  }
 0x15b   :  { %1030 = vmatpush1.bf16.msra.mxu0 %v1723_v43  ;;  %1132 = vmatpush1.bf16.msra.mxu1 %v1726_v34  ;;  %v449_v4 = vpack.c.bf16 %v441_v60, %v437_v58  ;;  %v432_v23 = vmax.f32 %v416_v16, 0.0  ;;  %v436_v37 = vmax.f32 %v420_v61, 0.0  ;;  %v419_v35 = vadd.f32 %v2061_v11, %v381_v20  ;;  %v1753_v41 = vld [vmem:[#allocation3 + $0x22c] ss:$12 sps:$4 sm:$0xff]   ;;  %v1751_v30 = vld [vmem:[#allocation3 + $0x228] ss:$12 sps:$4 sm:$0xff]   ;;  %v1203_v33 = vpop.permute.xlu1 %1202  ;;  %v1188_v34 = vpop.permute.xlu0 %1187 }
 0x15c   :  { %1018 = vmatprep.mubr.bf16.mxu0 %v450_v55  ;;  %1122 = vmatprep.mubr.bf16.mxu1 %v450_v55  ;;  %v431_v6 = vmax.f32 %v415_v62, 0.0  ;;  %v424_v8 = vadd.f32 %v408_v12, %v386_v40  ;;  %v389_v9 = vmul.f32 %v366_v27, %v2004_v57  ;;  %v423_v2 = vadd.f32 %v2061_v11, %v385_v63  ;;  %v1745_v27 = vld [vmem:[#allocation3 + $0x1fc] ss:$12 sps:$4 sm:$0xff]   ;;  %v1757_v31 = vld [vmem:[#allocation3 + $0x244] ss:$12 sps:$4 sm:$0xff]  }
 0x15d   :  { %1031 = vmatprep.subr.bf16.mxu0 %v1729_v59  ;;  %1133 = vmatprep.subr.bf16.mxu1 %v1794_v1  ;;  %v448_v54 = vpack.c.bf16 %v436_v37, %v432_v23  ;;  %v435_v7 = vmax.f32 %v419_v35, 0.0  ;;  %v1754_v42 = vld [vmem:[#allocation3 + $0x230] ss:$12 sps:$4 sm:$0xff]   ;;  %v1755_v49 = vld [vmem:[#allocation3 + $0x240] ss:$12 sps:$4 sm:$0xff]  }
 0x15e   :  { %v440_v10 = vmax.f32 %v424_v8, 0.0  ;;  %v427_v13 = vadd.f32 %v2061_v11, %v389_v9  ;;  %v439_v14 = vmax.f32 %v423_v2, 0.0  ;;  %v1741_v11 = vld [vmem:[#allocation3 + $0x1e4] ss:$12 sps:$4 sm:$0xff]   ;;  %v1758_v56 = vld [vmem:[#allocation3 + $0x248] ss:$12 sps:$4 sm:$0xff]  }
 0x15f   :  { %1032 = vmatpush1.bf16.msra.mxu0 %v1727_v52  ;;  %1134 = vmatpush1.bf16.msra.mxu1 %v1730_v0  ;;  %v447_v19 = vpack.c.bf16 %v435_v7, %v431_v6  ;;  %v1193_v44 = vpop.permute.xlu0 %1192  ;;  %v1184_v63 = vld [vmem:[%s2310_s6] ss:$4 sm:$0x7]  ;;  %v1589_v35 = vld [vmem:[%s2310_s6 + $0x1] ss:$4 sm:$0x7] }
 0x160   :  { %1033 = vmatprep.subr.bf16.mxu0 %v1733_v53  ;;  %1135 = vmatprep.subr.bf16.mxu1 %v1794_v1  ;;  %v452_v57 = vpack.c.bf16 %v444_v32, %v440_v10  ;;  %v443_v12 = vmax.f32 %v427_v13, 0.0  ;;  %v1213_v23 = vrot.slane %v1184_v63, %v2049_v18  ;;  %v1217_v37 = vrot.slane %v1184_v63, %v2054_v45  ;;  %v1590_v53 = vld [vmem:[%s2310_s6 + $0x2] ss:$4 sm:$0x7] }
 0x161   :  { %v1267_v6 = vrot.slane %v1589_v35, %v2047_v5  ;;  %v1271_v8 = vrot.slane %v1589_v35, %v2049_v18  ;;  %v1275_v9 = vrot.slane %v1589_v35, %v2054_v45  ;;  %v1325_v2 = vrot.slane %v1590_v53, %v2047_v5 }
 0x162   :  { %1019 = vmatmul.mubr.bf16.gmra.mrb[4].mxu0 %v449_v4  ;;  %1123 = vmatmul.mubr.bf16.gmra.mrb[20].mxu1 %v449_v4  ;;  %v451_v22 = vpack.c.bf16 %v443_v12, %v439_v14  ;;  %v1209_v4 = vrot.slane %v1184_v63, %v2047_v5  ;;  %v2122_v7 = vmul.f32 %v1213_v23, %v1198_v50  ;;  %v553_v14 = vld [vmem:[%s2311_s7] sm:$0x7] }
 0x163   :  { %1034 = vmatpush1.bf16.msra.mxu0 %v1731_v15  ;;  %1136 = vmatpush1.bf16.msra.mxu1 %v1734_v17  ;;  %v2124_v10 = vmul.f32 %v1217_v37, %v1198_v50  ;;  %v1329_v13 = vrot.slane %v1590_v53, %v2049_v18  ;;  %v2132_v17 = vmul.f32 %v1213_v23, %v1188_v34 }
 0x164   :  { %1585 = vmatprep.mubr.msk.bf16.mxu0 %vm82_vm0, %v448_v54  ;;  %1587 = vmatprep.mubr.msk.bf16.mxu1 %vm82_vm0, %v448_v54  ;;  %v2120_v54 = vmul.f32 %v1209_v4, %v1198_v50  ;;  %v2130_v15 = vmul.f32 %v1209_v4, %v1188_v34 }
 0x165   :  { %1035 = vmatprep.subr.bf16.mxu0 %v1737_v21  ;;  %1137 = vmatprep.subr.bf16.mxu1 %v1794_v1 }
 0x167   :  { %1036 = vmatpush1.bf16.msra.mxu0 %v1735_v46  ;;  %1138 = vmatpush1.bf16.msra.mxu1 %v1738_v24  ;;  %v2139_v46 = vmul.f32 %v1213_v23, %v1203_v33  ;;  %v2141_v24 = vmul.f32 %v1217_v37, %v1203_v33 }
 0x168   :  { %1037 = vmatprep.subr.bf16.mxu0 %v1741_v11  ;;  %1139 = vmatprep.subr.bf16.mxu1 %v1794_v1  ;;  %v2144_v11 = vrot.slane %v553_v14, %v2047_v5 }
 0x169   :  { %2316 = vst [vmem:[#allocation6_spill] sm:$0xff] %v2139_v46 }
 0x16b   :  { %1038 = vmatpush1.bf16.msra.mxu0 %v1739_v25  ;;  %1140 = vmatpush1.bf16.msra.mxu1 %v1742_v26  ;;  %v2146_v25 = vmul.f32 %v1209_v4, %v1193_v44  ;;  %v2148_v26 = vmul.f32 %v1213_v23, %v1193_v44 }
 0x16c   :  { %1039 = vmatprep.subr.bf16.mxu0 %v1745_v27  ;;  %1141 = vmatprep.subr.bf16.mxu1 %v1794_v1  ;;  %v2150_v27 = vmul.f32 %v1217_v37, %v1193_v44 }
 0x16f   :  { %1040 = vmatpush1.bf16.msra.mxu0 %v1743_v3  ;;  %1142 = vmatpush1.bf16.msra.mxu1 %v1746_v28  ;;  %v2153_v3 = vrot.slane %v553_v14, %v2054_v45 }
 0x170   :  { %1041 = vmatprep.subr.bf16.mxu0 %v1749_v47  ;;  %1143 = vmatprep.subr.bf16.mxu1 %v1794_v1 }
 0x173   :  { %1042 = vmatpush1.bf16.msra.mxu0 %v1747_v48  ;;  %1144 = vmatpush1.bf16.msra.mxu1 %v1750_v29 }
 0x174   :  { %1043 = vmatprep.subr.bf16.mxu0 %v1753_v41  ;;  %1145 = vmatprep.subr.bf16.mxu1 %v1794_v1  ;;  %v1591_v41 = vld [vmem:[%s2310_s6 + $0x3] ss:$4 sm:$0x7] }
 0x177   :  { %1044 = vmatpush1.bf16.msra.mxu0 %v1751_v30  ;;  %1146 = vmatpush1.bf16.msra.mxu1 %v1754_v42 }
 0x178   :  { %1045 = vmatprep.subr.bf16.mxu0 %v1757_v31  ;;  %1147 = vmatprep.subr.bf16.mxu1 %v1794_v1 }
 0x17b   :  { %1046 = vmatpush1.bf16.msra.mxu0 %v1755_v49  ;;  %1148 = vmatpush1.bf16.msra.mxu1 %v1758_v56 }
 0x17e   :  { %1062 = vmatmul.mubr.bf16.vlgmr.msra.gmra.mrb[0].mxu0 %v447_v19  ;;  %1164 = vmatmul.mubr.bf16.vlgmr.msra.gmra.mrb[24].mxu1 %v447_v19  ;;  %v2134_v19 = vmul.f32 %v1217_v37, %v1188_v34 }
 0x17f   :  { %1586 = vmatprep.mubr.msk.bf16.mxu0 %vm82_vm0, %v452_v57  ;;  %1588 = vmatprep.mubr.msk.bf16.mxu1 %vm82_vm0, %v452_v57  ;;  %v1333_v57 = vrot.slane %v1590_v53, %v2054_v45 }
 0x186   :  { %1072 = vmatmul.mubr.bf16.gmra.mrb[4].mxu0 %v451_v22  ;;  %1172 = vmatmul.mubr.bf16.gmra.mrb[28].mxu1 %v451_v22  ;;  %v2137_v22 = vmul.f32 %v1209_v4, %v1203_v33  ;;  %v1431_v4 = vld [vmem:[%s2312_s8] sm:$0x7] }
 0x18f   :  { %v1253_v39 = vpop.permute.xlu1 %1252  ;;  %v1249_v40 = vpop.permute.xlu0 %1248 }
 0x190   :  { %v2155_v28 = vmul.f32 %v1267_v6, %v1253_v39  ;;  %v2157_v47 = vmul.f32 %v1271_v8, %v1253_v39  ;;  %v2159_v48 = vmul.f32 %v1275_v9, %v1253_v39  ;;  %v2161_v29 = vmul.f32 %v1267_v6, %v1249_v40 }
 0x191   :  { %v2170_v31 = vmul.f32 %v1271_v8, %v1249_v40  ;;  %v1281_v49 = vmul.f32 %v1275_v9, %v1249_v40  ;;  %v1383_v39 = vrot.slane %v1591_v41, %v2047_v5 }
 0x193   :  { %v1257_v58 = vpop.permute.xlu1 %1256  ;;  %v1261_v0 = vpop.permute.xlu0 %1260 }
 0x194   :  { %v2166_v30 = vmul.f32 %v1267_v6, %v1257_v58  ;;  %v2168_v42 = vmul.f32 %v1271_v8, %v1257_v58  ;;  %v2172_v50 = vmul.f32 %v1275_v9, %v1257_v58  ;;  %v2174_v33 = vmul.f32 %v1267_v6, %v1261_v0 }
 0x195   :  { %v2178_v34 = vmul.f32 %v1275_v9, %v1261_v0 }
 0x196   :  { %2317 = vst [vmem:[#allocation7_spill] sm:$0xff] %v2168_v42  ;;  %2318 = vst [vmem:[#allocation8_spill] sm:$0xff] %v2174_v33 }
 0x197   :  { %2320 = vst [vmem:[#allocation10_spill] sm:$0xff] %v2178_v34 }
 0x198   :  { %v1307_v62 = vpop.permute.xlu1 %1306  ;;  %v1311_v21 = vpop.permute.xlu0 %1310 }
 0x199   :  { %v1341_v37 = vmul.f32 %v1329_v13, %v1311_v21  ;;  %v1342_v35 = vmul.f32 %v1333_v57, %v1311_v21 }
 0x19c   :  { %v1315_v52 = vpop.permute.xlu1 %1314 }
 0x19d   :  { %v1365_v44 = vpop.permute.xlu0 %1364  ;;  %v2185_v58 = vmul.f32 %v1329_v13, %v1315_v52 }
 0x19e   :  { %v1395_v53 = vmul.f32 %v1383_v39, %v1365_v44 }
 0x19f   :  { %2321 = vst [vmem:[#allocation11_spill] sm:$0xff] %v2185_v58 }
 0x1a0   :  { %v1319_v12 = vpop.permute.xlu1 %1318 }
 0x1a1   :  { %v2189_v40 = vmul.f32 %v1325_v2, %v1319_v12  ;;  %v2191_v63 = vmul.f32 %v1329_v13, %v1319_v12  ;;  %v2199_v23 = vmul.f32 %v1333_v57, %v1319_v12  ;;  %v2206_v12 = vrot.slane %v1431_v4, %v2047_v5 }
 0x1a3   :  { %2322 = vst [vmem:[#allocation12_spill] sm:$0xff] %v2189_v40  ;;  %2323 = vst [vmem:[#allocation13_spill] sm:$0xff] %v2191_v63 }
 0x1a4   :  { %2324 = vst [vmem:[#allocation14_spill] sm:$0xff] %v2199_v23 }
 0x1a5   :  { %v1369_v56 = vpop.permute.xlu1 %1368 }
 0x1a9   :  { %v1373_v9 = vpop.permute.xlu1 %1372 }
 0x1aa   :  { %v2215_v33 = vmul.f32 %v1383_v39, %v1373_v9 }
 0x1ac   :  { %2326 = vst [vmem:[#allocation16_spill] sm:$0xff] %v2215_v33  ;;  %v2229_v33 = vrot.slane %v1431_v4, %v2049_v18 }
 0x22d   :  { %v1609_v43 = vpop.f32.mrb[16].mxu1 }
 0x22e   :  { %v1610_v38 = vpop.f32.mrb[17].mxu1 }
 0x22f   :  { %v2096_v51 = vadd.f32 %v1610_v38, %v1609_v43  ;;  %v1612_v36 = vpop.f32.mrb[18].mxu1  ;;  %v2176_v43 = vmul.f32 %v1271_v8, %v1261_v0  ;;  %v1337_v38 = vmul.f32 %v1325_v2, %v1307_v62  ;;  %v2194_v0 = vrot.slane %v553_v14, %v2049_v18 }
 0x230   :  { %v1613_v1 = vpop.f32.mrb[19].mxu1 }
 0x231   :  { %v2098_v55 = vadd.f32 %v1613_v1, %v1612_v36  ;;  %2319 = vst [vmem:[#allocation9_spill] sm:$0xff] %v2176_v43  ;;  %v1387_v36 = vrot.slane %v1591_v41, %v2049_v18  ;;  %v1391_v1 = vrot.slane %v1591_v41, %v2054_v45  ;;  %v1377_v41 = vpop.permute.xlu0 %1376  ;;  %v1398_v43 = vmul.f32 %v1383_v39, %v1369_v56 }
 0x232   :  { %v2226_v42 = vmul.f32 %v1383_v39, %v1377_v41 }
 0x233   :  { %v1396_v6 = vmul.f32 %v1387_v36, %v1365_v44  ;;  %v1397_v8 = vmul.f32 %v1391_v1, %v1365_v44  ;;  %v2203_v40 = vmul.f32 %v1387_v36, %v1369_v56  ;;  %v1400_v58 = vmul.f32 %v1391_v1, %v1369_v56 }
 0x234   :  { %v2212_v44 = vrot.slane %v1431_v4, %v2054_v45  ;;  %v2217_v56 = vmul.f32 %v1387_v36, %v1373_v9  ;;  %v2219_v5 = vmul.f32 %v1391_v1, %v1373_v9 }
 0x235   :  { %v1615_v59 = vpop.f32.mrb[20].mxu1 }
 0x236   :  { %v1616_v60 = vpop.f32.mrb[21].mxu1  ;;  %2325 = vst [vmem:[#allocation15_spill] sm:$0xff] %v2212_v44  ;;  %2327 = vst [vmem:[#allocation17_spill] sm:$0xff] %v2217_v56 }
 0x237   :  { %v2100_v16 = vadd.f32 %v1616_v60, %v1615_v59  ;;  %v1618_v61 = vpop.f32.mrb[22].mxu1  ;;  %v1338_v59 = vmul.f32 %v1329_v13, %v1307_v62  ;;  %v1339_v60 = vmul.f32 %v1333_v57, %v1307_v62  ;;  %v1340_v62 = vmul.f32 %v1325_v2, %v1311_v21 }
 0x238   :  { %v1619_v20 = vpop.f32.mrb[23].mxu1 }
 0x239   :  { %v2102_v32 = vadd.f32 %v1619_v20, %v1618_v61  ;;  %v2183_v61 = vmul.f32 %v1325_v2, %v1315_v52  ;;  %v2187_v20 = vmul.f32 %v1333_v57, %v1315_v52  ;;  %v1117_v52 = vadd.f32 %v2096_v51, %v2153_v3 }
 0x23a   :  { %v1120_v51 = vadd.f32 %v2098_v55, %v2153_v3 }
 0x251   :  { %v1063_v63 = vpop.f32.mrb[0].mxu0  ;;  %v1165_v14 = vpop.f32.mrb[24].mxu1 }
 0x252   :  { %v1621_v2 = vadd.f32 %v1063_v63, %v2144_v11  ;;  %v1166_v13 = vadd.f32 %v1165_v14, %v1117_v52  ;;  %v1065_v57 = vpop.f32.mrb[1].mxu0  ;;  %v1167_v21 = vpop.f32.mrb[25].mxu1 }
 0x253   :  { %v1622_v23 = vadd.f32 %v1065_v57, %v2194_v0  ;;  %v1067_v34 = vpop.f32.mrb[2].mxu0  ;;  %v1168_v46 = vpop.f32.mrb[26].mxu1 }
 0x254   :  { %v1233_v63 = vadd.f32 %v1621_v2, %v2130_v15  ;;  %v1235_v52 = vadd.f32 %v2134_v19, %v1166_v13  ;;  %v1623_v14 = vadd.f32 %v1067_v34, %v2144_v11  ;;  %v1169_v55 = vadd.f32 %v1168_v46, %v1120_v51  ;;  %v1069_v21 = vpop.f32.mrb[3].mxu0  ;;  %v1170_v45 = vpop.f32.mrb[27].mxu1 }
 0x255   :  { %v1234_v44 = vadd.f32 %v1622_v23, %v2132_v17  ;;  %v1624_v57 = vadd.f32 %v1069_v21, %v2194_v0  ;;  %v2236_v2 = vmul.f32 %v1387_v36, %v1377_v41  ;;  %v2238_v17 = vmul.f32 %v1391_v1, %v1377_v41 }
 0x256   :  { %v1291_v9 = vadd.f32 %v2161_v29, %v1233_v63  ;;  %v1293_v56 = vadd.f32 %v1281_v49, %v1235_v52  ;;  %v1236_v15 = vadd.f32 %v1623_v14, %v2146_v25  ;;  %v1238_v19 = vadd.f32 %v2150_v27, %v1169_v55 }
 0x257   :  { %v1292_v46 = vadd.f32 %v2170_v31, %v1234_v44  ;;  %v1237_v34 = vadd.f32 %v1624_v57, %v2148_v26  ;;  %v1125_v27 = vadd.f32 %v2100_v16, %v2153_v3  ;;  %v1128_v26 = vadd.f32 %v2102_v32, %v2153_v3 }
 0x258   :  { %v1349_v39 = vadd.f32 %v1337_v38, %v1291_v9  ;;  %v1351_v23 = vadd.f32 %v1339_v60, %v1293_v56  ;;  %v1294_v18 = vadd.f32 %v2155_v28, %v1236_v15  ;;  %v1296_v4 = vadd.f32 %v2159_v48, %v1238_v19 }
 0x259   :  { %v1350_v29 = vadd.f32 %v1338_v59, %v1292_v46  ;;  %v1295_v49 = vadd.f32 %v2157_v47, %v1237_v34  ;;  %v1073_v25 = vpop.f32.mrb[4].mxu0  ;;  %v1173_v31 = vpop.f32.mrb[28].mxu1 }
 0x25a   :  { %v1352_v36 = vadd.f32 %v1340_v62, %v1294_v18  ;;  %v1354_v1 = vadd.f32 %v1342_v35, %v1296_v4  ;;  %v1407_v38 = vadd.f32 %v1395_v53, %v1349_v39  ;;  %v1409_v60 = vadd.f32 %v1397_v8, %v1351_v23  ;;  %v1075_v41 = vpop.f32.mrb[5].mxu0  ;;  %v1175_v28 = vpop.f32.mrb[29].mxu1  ;;  %v2330_v39 = vld [vmem:[#allocation6_spill] sm:$0xff]  ;;  %v2331_v23 = vld [vmem:[#allocation15_spill] sm:$0xff]  ;;  %v2333_v4 = vld [vmem:[#allocation16_spill] sm:$0xff] }
 0x25b   :  { %v1353_v13 = vadd.f32 %v1341_v37, %v1295_v49  ;;  %v1408_v48 = vadd.f32 %v1396_v6, %v1350_v29  ;;  %v1625_v59 = vadd.f32 %v1073_v25, %v2144_v11  ;;  %v1174_v47 = vadd.f32 %v1173_v31, %v1125_v27  ;;  %v1077_v51 = vpop.f32.mrb[6].mxu0  ;;  %v1176_v44 = vpop.f32.mrb[30].mxu1  ;;  %v2332_v18 = vld [vmem:[#allocation10_spill] sm:$0xff]  ;;  %v2336_v31 = vld [vmem:[#allocation9_spill] sm:$0xff] }
 0x25c   :  { %v1419_v56 = vmax.f32 %v1407_v38, 0.0  ;;  %v1421_v16 = vmax.f32 %v1409_v60, 0.0  ;;  %v1410_v63 = vadd.f32 %v1398_v43, %v1352_v36  ;;  %v1412_v52 = vadd.f32 %v1400_v58, %v1354_v1  ;;  %v1079_v14 = vpop.f32.mrb[7].mxu0  ;;  %v1178_v32 = vpop.f32.mrb[31].mxu1  ;;  %v2337_v1 = vld [vmem:[#allocation14_spill] sm:$0xff] }
 0x25d   :  { %v1420_v3 = vmax.f32 %v1408_v48, 0.0  ;;  %v1411_v62 = vadd.f32 %v2203_v40, %v1353_v13  ;;  %v1239_v35 = vadd.f32 %v1625_v59, %v2120_v54  ;;  %v1241_v53 = vadd.f32 %v2124_v10, %v1174_v47  ;;  %v2338_v13 = vld [vmem:[#allocation13_spill] sm:$0xff] }
 0x25e   :  { %v1422_v37 = vmax.f32 %v1410_v63, 0.0  ;;  %v1424_v6 = vmax.f32 %v1412_v52, 0.0  ;;  %v1626_v8 = vadd.f32 %v1075_v41, %v2194_v0  ;;  %v1627_v55 = vadd.f32 %v1077_v51, %v2144_v11  ;;  %v2339_v59 = vld [vmem:[#allocation17_spill] sm:$0xff] }
 0x25f   :  { %v1423_v21 = vmax.f32 %v1411_v62, 0.0  ;;  %v1297_v45 = vadd.f32 %v2166_v30, %v1239_v35  ;;  %v1299_v43 = vadd.f32 %v2172_v50, %v1241_v53  ;;  %v1177_v58 = vadd.f32 %v1176_v44, %v1128_v26  ;;  %v2328_v30 = vld [vmem:[#allocation7_spill] sm:$0xff]  ;;  %v2329_v50 = vld [vmem:[#allocation8_spill] sm:$0xff] }
 0x260   :  { %v1240_v57 = vadd.f32 %v1626_v8, %v2122_v7  ;;  %v1242_v40 = vadd.f32 %v1627_v55, %v2137_v22  ;;  %v1628_v54 = vadd.f32 %v1079_v14, %v2194_v0  ;;  %v1448_v10 = vmul.f32 %v2206_v12, %v1419_v56 }
 0x261   :  { %v1355_v9 = vadd.f32 %v2183_v61, %v1297_v45  ;;  %v1357_v15 = vadd.f32 %v2187_v20, %v1299_v43  ;;  %v1244_v11 = vadd.f32 %v2141_v24, %v1177_v58  ;;  %v1449_v19 = vmul.f32 %v2229_v33, %v1420_v3  ;;  %v2334_v20 = vld [vmem:[#allocation11_spill] sm:$0xff]  ;;  %v2335_v24 = vld [vmem:[#allocation12_spill] sm:$0xff] }
 0x262   :  { %v1298_v46 = vadd.f32 %v2328_v30, %v1240_v57  ;;  %v1300_v34 = vadd.f32 %v2329_v50, %v1242_v40  ;;  %v1243_v7 = vadd.f32 %v1628_v54, %v2330_v39  ;;  %v1450_v22 = vmul.f32 %v2331_v23, %v1421_v16  ;;  %v1592_v40 = vld [vmem:[#allocation2] ss:$0 sm:$0xff] }
 0x263   :  { %v1302_v0 = vadd.f32 %v2332_v18, %v1244_v11  ;;  %v1413_v29 = vadd.f32 %v2333_v4, %v1355_v9  ;;  %v1415_v61 = vadd.f32 %v2219_v5, %v1357_v15  ;;  %v1460_v49 = vadd.f32 %v1449_v19, %v1448_v10 }
 0x264   :  { %v1356_v25 = vadd.f32 %v2334_v20, %v1298_v46  ;;  %v1358_v27 = vadd.f32 %v2335_v24, %v1300_v34  ;;  %v1301_v26 = vadd.f32 %v2336_v31, %v1243_v7  ;;  %v1462_v36 = vsel %vm1461_vm1, %v1450_v22, 0.0 }
 0x265   :  { %v1360_v38 = vadd.f32 %v2337_v1, %v1302_v0  ;;  %v1425_v60 = vmax.f32 %v1413_v29, 0.0  ;;  %v1427_v41 = vmax.f32 %v1415_v61, 0.0  ;;  %v1463_v28 = vadd.f32 %v1462_v36, %v1460_v49 }
 0x266   :  { %v1359_v48 = vadd.f32 %v2338_v13, %v1301_v26  ;;  %v1414_v47 = vadd.f32 %v2339_v59, %v1356_v25  ;;  %v1416_v5 = vadd.f32 %v2226_v42, %v1358_v27  ;;  %v1451_v51 = vmul.f32 %v2206_v12, %v1422_v37 }
 0x267   :  { %v1418_v44 = vadd.f32 %v2238_v17, %v1360_v38  ;;  %1464 = vadd.xlane.f32.xlu1 %v1463_v28  ;;  %v1452_v56 = vmul.f32 %v2229_v33, %v1423_v21  ;;  %v1453_v16 = vmul.f32 %v2331_v23, %v1424_v6  ;;  %v1454_v32 = vmul.f32 %v2206_v12, %v1425_v60 }
 0x268   :  { %v1426_v63 = vmax.f32 %v1414_v47, 0.0  ;;  %v1417_v52 = vadd.f32 %v2236_v2, %v1359_v48  ;;  %v1428_v14 = vmax.f32 %v1416_v5, 0.0  ;;  %v1456_v35 = vmul.f32 %v2331_v23, %v1427_v41 }
 0x269   :  { %v1430_v3 = vmax.f32 %v1418_v44, 0.0  ;;  %v1466_v62 = vadd.f32 %v1452_v56, %v1451_v51  ;;  %v1467_v53 = vsel %vm1461_vm1, %v1453_v16, 0.0 }
 0x26a   :  { %v1429_v42 = vmax.f32 %v1417_v52, 0.0  ;;  %v1455_v17 = vmul.f32 %v2229_v33, %v1426_v63  ;;  %v1457_v37 = vmul.f32 %v2206_v12, %v1428_v14  ;;  %v1472_v21 = vsel %vm1461_vm1, %v1456_v35, 0.0 }
 0x26b   :  { %v1468_v8 = vadd.f32 %v1467_v53, %v1466_v62  ;;  %v1459_v6 = vmul.f32 %v2331_v23, %v1430_v3 }
 0x26c   :  { %v1471_v55 = vadd.f32 %v1455_v17, %v1454_v32  ;;  %v1458_v2 = vmul.f32 %v2229_v33, %v1429_v42 }
 0x26d   :  { %1469 = vadd.xlane.f32.xlu0 %v1468_v8  ;;  %v1477_v58 = vsel %vm1461_vm1, %v1459_v6, 0.0 }
 0x26e   :  { %v1473_v45 = vadd.f32 %v1472_v21, %v1471_v55  ;;  %v1476_v43 = vadd.f32 %v1458_v2, %v1457_v37 }
 0x270   :  { %v1478_v57 = vadd.f32 %v1477_v58, %v1476_v43 }
 0x271   :  { %1474 = vadd.xlane.f32.xlu0 %v1473_v45 }
 0x272   :  { %1479 = vadd.xlane.f32.xlu1 %v1478_v57 }
 0x2f4   :  { %v1465_v54 = vpop.xlane.xlu1 %1464 }
 0x2f5   :  { %v1488_v12 = vadd.f32 %v1592_v40, %v1465_v54 }
 0x2f7   :  { %1493 = vst.msk [vmem:[%s2314_s10] sm:$0xff] %vm1492_vm2, %v1488_v12 }
 0x2fa   :  { %v1470_v10 = vpop.xlane.xlu0 %1469 }
 0x2fb   :  { %v1489_v33 = vadd.f32 %v1592_v40, %v1470_v10 }
 0x2fd   :  { %1494 = vst.msk [vmem:[%s2314_s10 + $0x8] sm:$0xff] %vm1492_vm2, %v1489_v33 }
 0x2fe   :  { %v1475_v9 = vpop.xlane.xlu0 %1474 }
 0x2ff   :  { %v1490_v15 = vadd.f32 %v1592_v40, %v1475_v9  ;;  %v1480_v11 = vpop.xlane.xlu1 %1479 }
 0x300   :  { %v1491_v19 = vadd.f32 %v1592_v40, %v1480_v11 }
 0x301   :  { %1495 = vst.msk [vmem:[%s2314_s10 + $0x10] sm:$0xff] %vm1492_vm2, %v1490_v15 }
 0x302   :  { %1496 = vst.msk [vmem:[%s2314_s10 + $0x18] sm:$0xff] %vm1492_vm2, %v1491_v19 }
 0x303   :  { %1501 = vsyncpa [#allocation4], 1 }

</bundles_post_ra>
